<compile_context>
chip_gen: v7x
topology: tpu7x:2x2x1
jax: 0.10.0
libtpu: 0.0.40
codegen_flags: <defaults>
</compile_context>

<pallas_src>
import functools
import math

import jax
import jax.numpy as jnp
from jax import lax
from jax.experimental import pallas as pl
from jax.experimental.pallas import tpu as pltpu

ALPHA = 0.25
GAMMA = 2.0
LANES = 128
MAX_TILE_ROWS = 2048   # (2048,128) f32 = 1 MiB per input tile


def _min_sublanes(dtype):
    # Minimum sublane multiple for a hardware tile at this element width.
    return {4: 8, 2: 16, 1: 32}[jnp.dtype(dtype).itemsize]


def _num_tensorcores():
    """TensorCores per chip: 2 on v7x, 1 on v5e/v6e.  Conservative fallback 1."""
    try:
        info = pltpu.get_tpu_info()
        for attr in ("num_cores", "core_count", "num_tensorcores", "tensorcore_count"):
            v = getattr(info, attr, None)
            if isinstance(v, int) and v >= 1:
                return v
    except Exception:
        pass
    try:
        v = getattr(jax.devices()[0], "num_cores", None)
        if isinstance(v, int) and v >= 1:
            return v
    except Exception:
        pass
    return 1


def _focal_loss_kernel(x_ref, t_ref, o_ref, acc_ref, *, alpha, gamma,
                       rows, tile_rows, tiles_per_shard, needs_mask):
    i = pl.program_id(1)  # sequential reduction axis within each core shard

    @pl.when(i == 0)
    def _():
        acc_ref[...] = jnp.zeros_like(acc_ref)

    x = x_ref[...].astype(jnp.float32)
    t = t_ref[...].astype(jnp.float32)

    if needs_mask:
        # Rows past the real row count (partial last block / excess shard
        # tiles) contain stale VMEM garbage.  Zero x AND t *before* the
        # transcendentals so no NaN/Inf can be produced; the zeroed slots then
        # contribute the compile-time constant loss of (x=0, t=0), which the
        # wrapper subtracts exactly.  Cost: 1 iota + 1 cmp + 2 selects.
        base = (pl.program_id(0) * tiles_per_shard + i) * tile_rows
        row = lax.broadcasted_iota(jnp.int32, x.shape, 0)
        valid = row < (rows - base)            # scalar compare, no 32-bit flat-index overflow
        x = jnp.where(valid, x, 0.0)
        t = jnp.where(valid, t, 0.0)

    # Shared e = exp(-|x|) feeds both the numerically-stable BCE-with-logits
    #   bce = max(x,0) - x*t + log1p(exp(-|x|))
    # and sigmoid(x) = where(x>=0, 1/(1+e), e/(1+e)): one exp + one log1p per element.
    e = jnp.exp(-jnp.abs(x))
    bce = jnp.maximum(x, 0.0) - x * t + jnp.log1p(e)
    d = 1.0 + e
    # Approximate reciprocal on the EUP (a slot with lots of headroom here),
    # plus one Newton step on the VPU to restore ~1e-7 accuracy.
    inv = pl.reciprocal(d, approx=True)
    inv = inv * (2.0 - d * inv)
    probs = jnp.where(x >= 0.0, inv, e * inv)

    # u == 1 - p_t, fused:  p_t = probs*t + (1-probs)*(1-t)  =>  u = probs + t - 2*probs*t
    u = probs + t - 2.0 * (probs * t)
    if gamma == 2.0:
        focal_term = u * u                      # single VPU multiply, no pow
    elif gamma == 0.0:
        focal_term = jnp.ones_like(u)
    else:
        focal_term = jnp.where(
            u > 0.0, jnp.exp(gamma * jnp.log(jnp.maximum(u, 1e-30))), 0.0)

    # alpha_weight = alpha*t + (1-alpha)*(1-t), fused with folded constants.
    alpha_weight = (1.0 - alpha) + (2.0 * alpha - 1.0) * t
    focal = alpha_weight * focal_term * bce

    # Vector accumulate onto one (8,128) f32 slab (pure VPU adds).
    if tile_rows % 8 == 0:
        acc_ref[...] += focal.reshape(tile_rows // 8, 8, LANES).sum(axis=0)
    else:
        # Tiny-input path (block equals the full, sub-8-row array).
        acc_ref[0:1, :] += focal.sum(axis=0, keepdims=True)

    # Final cross-sublane + cross-lane collapse on the XLU (idle slot), once
    # per shard, emitting a single f32 scalar block.
    @pl.when(i == pl.num_programs(1) - 1)
    def _():
        s = acc_ref[...].sum(axis=0, keepdims=True)   # (1, 128) sublane reduce
        o_ref[...] = s.sum(axis=1, keepdims=True)     # (1, 1)   lane reduce


def focal_loss(inputs, targets, alpha=ALPHA, gamma=GAMMA, reduction="mean",
               num_shards=None):
    """Binary focal loss over all elements of `inputs` / `targets` (any shape)."""
    assert inputs.shape == targets.shape
    if reduction not in ("mean", "sum"):
        # TODO(synk): reduction='none' (per-element loss output) is not implemented
        # in this fused-reduction kernel.
        raise NotImplementedError("pallas focal_loss supports reduction in {'mean','sum'}")

    n_elems = int(inputs.size)
    rows = pl.cdiv(n_elems, LANES)
    min_rows = max(_min_sublanes(inputs.dtype), _min_sublanes(targets.dtype))

    # Tile rows: biggest hardware-aligned tile that does not exceed the array,
    # so only the *last* block of the grid can be partial (handled in-kernel).
    if rows < min_rows:
        tile_rows = rows                      # block == full dim (always legal)
    else:
        tile_rows = min(MAX_TILE_ROWS, (rows // min_rows) * min_rows)
    tiles_total = pl.cdiv(rows, tile_rows)

    if num_shards is None:
        num_shards = _num_tensorcores()
    num_shards = max(1, min(int(num_shards), 2, tiles_total))
    tiles_per_shard = pl.cdiv(tiles_total, num_shards)

    grid_rows = num_shards * tiles_per_shard * tile_rows
    needs_mask = grid_rows > rows
    lane_pad = rows * LANES - n_elems          # < 128 elements
    pad_slots = grid_rows * LANES - n_elems    # zero-pad + masked slots

    # Keep native dtypes (bf16 logits stay narrow on the HBM->VMEM path).
    xf = inputs.reshape(-1)
    tf = targets.reshape(-1)
    if lane_pad:
        # Only the sub-row sliver needed to reshape to (rows, 128).
        # TODO(synk): this still materializes a copy when n % 128 != 0; a fully
        # copy-free path would require 1-D block handling of the flat array.
        xf = jnp.pad(xf, (0, lane_pad))
        tf = jnp.pad(tf, (0, lane_pad))
    x2 = xf.reshape(rows, LANES)
    t2 = tf.reshape(rows, LANES)

    kernel = functools.partial(
        _focal_loss_kernel,
        alpha=float(alpha), gamma=float(gamma),
        rows=rows, tile_rows=tile_rows,
        tiles_per_shard=tiles_per_shard, needs_mask=needs_mask,
    )

    last_block = tiles_total - 1
    if num_shards * tiles_per_shard > tiles_total:
        # Excess tiles of the last shard: clamp to the last real block (the
        # in-kernel mask zeroes their nominal rows, so they only contribute
        # the known constant that the wrapper subtracts).
        in_map = lambda c, i: (jnp.minimum(c * tiles_per_shard + i, last_block), 0)
    else:
        in_map = lambda c, i: (c * tiles_per_shard + i, 0)

    partials = pl.pallas_call(
        kernel,
        out_shape=jax.ShapeDtypeStruct((num_shards, 1, 1), jnp.float32),
        grid_spec=pltpu.PrefetchScalarGridSpec(
            num_scalar_prefetch=0,
            grid=(num_shards, tiles_per_shard),
            in_specs=[
                pl.BlockSpec((tile_rows, LANES), in_map),
                pl.BlockSpec((tile_rows, LANES), in_map),
            ],
            # One f32 scalar per core shard, resident across the reduction axis.
            out_specs=pl.BlockSpec((None, 1, 1), lambda c, i: (c, 0, 0)),
            scratch_shapes=[pltpu.VMEM((8, LANES), jnp.float32)],
        ),
        compiler_params=pltpu.CompilerParams(
            dimension_semantics=("parallel", "arbitrary"),
        ),
    )(x2, t2)

    total = jnp.sum(partials)
    if pad_slots:
        # Every padded / masked slot evaluated the loss of (x=0, t=0):
        #   bce = ln 2, p_t = 0.5, focal_term = 0.5**gamma, weight = 1-alpha.
        zero_loss = (1.0 - float(alpha)) * (0.5 ** float(gamma)) * math.log(2.0)
        total = total - pad_slots * zero_loss
    if reduction == "mean":
        return total / n_elems
    return total


def focal_loss_ref(inputs, targets, alpha=ALPHA, gamma=GAMMA):
    x = inputs.astype(jnp.float32)
    t = targets.astype(jnp.float32)
    probs = jax.nn.sigmoid(x)
    bce = jnp.maximum(x, 0.0) - x * t + jnp.log1p(jnp.exp(-jnp.abs(x)))
    p_t = probs * t + (1.0 - probs) * (1.0 - t)
    focal_term = (1.0 - p_t) ** gamma
    alpha_weight = alpha * t + (1.0 - alpha) * (1.0 - t)
    return jnp.mean(alpha_weight * focal_term * bce)


if __name__ == "__main__":
    key = jax.random.PRNGKey(0)
    k1, k2, k3, k4 = jax.random.split(key, 4)

    # 1) Typical usage: f32 logits from an NCHW conv head + binary targets
    #    (2048 elements -> exact tiling, no pad, no mask).
    shape = (2, 4, 16, 16)
    x = jax.random.normal(k1, shape, dtype=jnp.float32) * 2.0
    t = jax.random.bernoulli(k2, p=0.3, shape=shape).astype(jnp.float32)
    loss = jax.block_until_ready(focal_loss(x, t))
    ref = focal_loss_ref(x, t)
    assert jnp.allclose(loss, ref, rtol=1e-4, atol=1e-6), (loss, ref)

    # 2) Ragged shape -> exercises lane pad + partial-last-block row mask +
    #    constant-subtraction correction.
    shape2 = (3, 5, 7, 11)
    x2 = jax.random.normal(k3, shape2, dtype=jnp.float32) * 2.0
    t2 = jax.random.bernoulli(k4, p=0.5, shape=shape2).astype(jnp.float32)
    loss2 = jax.block_until_ready(focal_loss(x2, t2))
    ref2 = focal_loss_ref(x2, t2)
    assert jnp.allclose(loss2, ref2, rtol=1e-4, atol=1e-6), (loss2, ref2)

    # 3) Native bf16 logits: no host-side f32 promotion, cast happens in-kernel.
    xb = x.astype(jnp.bfloat16)
    loss3 = jax.block_until_ready(focal_loss(xb, t))
    ref3 = focal_loss_ref(xb.astype(jnp.float32), t)
    assert jnp.allclose(loss3, ref3, rtol=1e-3, atol=1e-5), (loss3, ref3)

    # 4) 'sum' reduction path.
    loss4 = jax.block_until_ready(focal_loss(x2, t2, reduction="sum"))
    ref4 = focal_loss_ref(x2, t2) * x2.size
    assert jnp.allclose(loss4, ref4, rtol=1e-4, atol=1e-4), (loss4, ref4)

    print("KERNEL_OK")
</pallas_src>

<mosaic_0001>
module attributes {stable_mosaic.version = 11 : i64} {
  func.func @_focal_loss_kernel(%arg0: i32, %arg1: i32, %arg2: memref<16x128xf32, #tpu.memory_space<vmem>>, %arg3: memref<16x128xf32, #tpu.memory_space<vmem>>, %arg4: memref<1x1x1xf32, #tpu.memory_space<vmem>>, %arg5: memref<8x128xf32, #tpu.memory_space<vmem>>) attributes {dimension_semantics = [#tpu.dimension_semantics<parallel>, #tpu.dimension_semantics<arbitrary>], iteration_bounds = array<i64: 1, 1>, scalar_prefetch = 0 : i64, scratch_operands = 1 : i64, tpu.core_type = #tpu.core_type<tc>, window_params = [{transform_indices = @transform_0, window_bounds = array<i64: 16, 128>}, {transform_indices = @transform_1, window_bounds = array<i64: 16, 128>}, {transform_indices = @transform_2, window_bounds = array<i64: 1, 1, 1>}]} {
    %c0_i32 = arith.constant 0 : i32
    %0 = arith.cmpi eq, %arg1, %c0_i32 : i32
    %1 = arith.extui %0 : i1 to i32
    %c0_i32_0 = arith.constant 0 : i32
    %2 = arith.cmpi ne, %1, %c0_i32_0 : i32
    scf.if %2 {
      %cst_18 = arith.constant 0.000000e+00 : f32
      %46 = vector.broadcast %cst_18 : f32 to vector<8x128xf32>
      %c0_19 = arith.constant 0 : index
      %c0_20 = arith.constant 0 : index
      %47 = vector.load %arg5[%c0_19, %c0_20] : memref<8x128xf32, #tpu.memory_space<vmem>>, vector<8x128xf32>
      tpu.vector_store %arg5[%c0_19, %c0_20], %46 {strides = array<i32>} : memref<8x128xf32, #tpu.memory_space<vmem>>, vector<8x128xf32>,
    } else {
    }
    %c0 = arith.constant 0 : index
    %c0_1 = arith.constant 0 : index
    %3 = vector.load %arg2[%c0, %c0_1] : memref<16x128xf32, #tpu.memory_space<vmem>>, vector<16x128xf32>
    %c0_2 = arith.constant 0 : index
    %c0_3 = arith.constant 0 : index
    %4 = vector.load %arg3[%c0_2, %c0_3] : memref<16x128xf32, #tpu.memory_space<vmem>>, vector<16x128xf32>
    %5 = math.absf %3 : vector<16x128xf32>
    %cst = arith.constant 0.000000e+00 : f32
    %6 = vector.broadcast %cst : f32 to vector<16x128xf32>
    %7 = arith.subf %6, %5 : vector<16x128xf32>
    %8 = math.exp %7 : vector<16x128xf32>
    %cst_4 = arith.constant 0.000000e+00 : f32
    %9 = vector.broadcast %cst_4 : f32 to vector<16x128xf32>
    %10 = arith.maximumf %3, %9 : vector<16x128xf32>
    %11 = arith.mulf %3, %4 : vector<16x128xf32>
    %12 = arith.subf %10, %11 : vector<16x128xf32>
    %13 = math.log1p %8 : vector<16x128xf32>
    %14 = arith.addf %12, %13 : vector<16x128xf32>
    %cst_5 = arith.constant 1.000000e+00 : f32
    %15 = vector.broadcast %cst_5 : f32 to vector<16x128xf32>
    %16 = arith.addf %15, %8 : vector<16x128xf32>
    %17 = tpu.reciprocal %16 {approx = true} : vector<16x128xf32> -> vector<16x128xf32>
    %18 = arith.mulf %16, %17 : vector<16x128xf32>
    %cst_6 = arith.constant 2.000000e+00 : f32
    %19 = vector.broadcast %cst_6 : f32 to vector<16x128xf32>
    %20 = arith.subf %19, %18 : vector<16x128xf32>
    %21 = arith.mulf %17, %20 : vector<16x128xf32>
    %cst_7 = arith.constant 0.000000e+00 : f32
    %22 = vector.broadcast %cst_7 : f32 to vector<16x128xf32>
    %23 = arith.cmpf oge, %3, %22 : vector<16x128xf32>
    %24 = arith.mulf %8, %21 : vector<16x128xf32>
    %25 = arith.select %23, %21, %24 : vector<16x128xi1>, vector<16x128xf32>
    %26 = arith.addf %25, %4 : vector<16x128xf32>
    %27 = arith.mulf %25, %4 : vector<16x128xf32>
    %cst_8 = arith.constant 2.000000e+00 : f32
    %28 = vector.broadcast %cst_8 : f32 to vector<16x128xf32>
    %29 = arith.mulf %28, %27 : vector<16x128xf32>
    %30 = arith.subf %26, %29 : vector<16x128xf32>
    %31 = arith.mulf %30, %30 : vector<16x128xf32>
    %cst_9 = arith.constant -5.000000e-01 : f32
    %32 = vector.broadcast %cst_9 : f32 to vector<16x128xf32>
    %33 = arith.mulf %32, %4 : vector<16x128xf32>
    %cst_10 = arith.constant 7.500000e-01 : f32
    %34 = vector.broadcast %cst_10 : f32 to vector<16x128xf32>
    %35 = arith.addf %34, %33 : vector<16x128xf32>
    %36 = arith.mulf %35, %31 : vector<16x128xf32>
    %37 = arith.mulf %36, %14 : vector<16x128xf32>
    %c0_11 = arith.constant 0 : index
    %c0_12 = arith.constant 0 : index
    %38 = vector.load %arg5[%c0_11, %c0_12] : memref<8x128xf32, #tpu.memory_space<vmem>>, vector<8x128xf32>
    %39 = vector.shape_cast %37 : vector<16x128xf32> to vector<2x8x128xf32>
    %cst_13 = arith.constant dense<0.000000e+00> : vector<8x128xf32>
    %40 = vector.multi_reduction <add>, %39, %cst_13 [0] : vector<2x8x128xf32> to vector<8x128xf32>
    %41 = arith.addf %38, %40 : vector<8x128xf32>
    %c0_14 = arith.constant 0 : index
    %c0_15 = arith.constant 0 : index
    %42 = vector.load %arg5[%c0_14, %c0_15] : memref<8x128xf32, #tpu.memory_space<vmem>>, vector<8x128xf32>
    tpu.vector_store %arg5[%c0_14, %c0_15], %41 {strides = array<i32>} : memref<8x128xf32, #tpu.memory_space<vmem>>, vector<8x128xf32>,
    %c0_i32_16 = arith.constant 0 : i32
    %43 = arith.cmpi eq, %arg1, %c0_i32_16 : i32
    %44 = arith.extui %43 : i1 to i32
    %c0_i32_17 = arith.constant 0 : i32
    %45 = arith.cmpi ne, %44, %c0_i32_17 : i32
    scf.if %45 {
      %c0_18 = arith.constant 0 : index
      %c0_19 = arith.constant 0 : index
      %46 = vector.load %arg5[%c0_18, %c0_19] : memref<8x128xf32, #tpu.memory_space<vmem>>, vector<8x128xf32>
      %cst_20 = arith.constant dense<0.000000e+00> : vector<128xf32>
      %47 = vector.multi_reduction <add>, %46, %cst_20 [0] : vector<8x128xf32> to vector<128xf32>
      %48 = vector.shape_cast %47 : vector<128xf32> to vector<1x128xf32>
      %cst_21 = arith.constant dense<0.000000e+00> : vector<1xf32>
      %49 = vector.multi_reduction <add>, %48, %cst_21 [1] : vector<1x128xf32> to vector<1xf32>
      %50 = vector.shape_cast %49 : vector<1xf32> to vector<1x1xf32>
      %c0_22 = arith.constant 0 : index
      %c0_23 = arith.constant 0 : index
      %c0_24 = arith.constant 0 : index
      %51 = vector.load %arg4[%c0_22, %c0_23, %c0_24] : memref<1x1x1xf32, #tpu.memory_space<vmem>>, vector<1x1x1xf32>
      %52 = vector.shape_cast %51 : vector<1x1x1xf32> to vector<1x1xf32>
      %53 = vector.shape_cast %50 : vector<1x1xf32> to vector<1x1x1xf32>
      tpu.vector_store %arg4[%c0_22, %c0_23, %c0_24], %53 {strides = array<i32>} : memref<1x1x1xf32, #tpu.memory_space<vmem>>, vector<1x1x1xf32>,
    } else {
    }
    return
  }
  func.func @transform_0(%arg0: i32, %arg1: i32) -> (i32, i32) {
    %c1_i32 = arith.constant 1 : i32
    %0 = arith.muli %arg0, %c1_i32 : i32
    %1 = arith.addi %0, %arg1 : i32
    %c0_i32 = arith.constant 0 : i32
    %c0_i32_0 = arith.constant 0 : i32
    return %1, %c0_i32 : i32, i32
  }
  func.func @transform_1(%arg0: i32, %arg1: i32) -> (i32, i32) {
    %c1_i32 = arith.constant 1 : i32
    %0 = arith.muli %arg0, %c1_i32 : i32
    %1 = arith.addi %0, %arg1 : i32
    %c0_i32 = arith.constant 0 : i32
    %c0_i32_0 = arith.constant 0 : i32
    return %1, %c0_i32 : i32, i32
  }
  func.func @transform_2(%arg0: i32, %arg1: i32) -> (i32, i32, i32) {
    %c0_i32 = arith.constant 0 : i32
    %c0_i32_0 = arith.constant 0 : i32
    %c0_i32_1 = arith.constant 0 : i32
    return %arg0, %c0_i32, %c0_i32_0 : i32, i32, i32
  }
}

</mosaic_0001>

<bundles_post_ra>
// kernel: tpu_custom_call.1
= control target key start
LH: loop header
LB: loop body
LE: loop exit
PB: predicated region body
PF: predicated region fallthrough
CT: control target
= control target key end

     0   :  { %7 = vsyncpa [#allocation4], 0  ;;  %s320_s0 = inlined_call_operand.hbm [shape: f32[16,128], index: 0, kind: input, shape index: {}]   ;;  %s321_s1 = inlined_call_operand.hbm [shape: f32[16,128], index: 1, kind: input, shape index: {}]   ;;  %s322_s2 = inlined_call_operand.hbm [shape: f32[1,1,1], index: 2, kind: output, shape index: {}]  }
   0x1   :  { %8 = vsyncpa [#allocation7], 0 }
   0x2   :  { %9 = vsyncpa [#allocation5], 0  ;;  %s252_s9 = smov [#allocation3]   ;;  %s180_s13 = scalar_lea.hbm %s320_s0, 256 }
   0x3   :  { %s19_s10 = sshll.u32 %s252_s9, 4  ;;  %p181_p0 = scmp.ne.s32.totalorder %s320_s0, %s180_s13  ;;  %s20_s10 = int_to_ptr.vmem [resolvable:$true] %s19_s10 }
   0x4   :  { %p184_p1 = scmp.lt.u32.totalorder %s180_s13, %s320_s0 }
   0x6   :  { %p186_p2 = pnand %p184_p1, %p181_p0 }
   0x8   :  { %189 = shalt.err (!%p186_p2)
}
   0x9   :  { %s190_s18 = scalar_lea.vmem %s20_s10, 256  ;;  %p195_p4 = scmp.lt.s32.totalorder %s20_s10, %s20_s10 }
   0xa   :  { %p191_p3 = scmp.ne.s32.totalorder %s20_s10, %s190_s18  ;;  %p196_p5 = scmp.lt.s32.totalorder %s190_s18, %s190_s18 }
   0xc   :  { %p197_p6 = por %p196_p5, %p195_p4 }
   0xe   :  { %p198_p7 = pnand %p197_p6, %p191_p3 }
  0x10   :  { %201 = shalt.err (!%p198_p7)
}
  0x11   :  { %s253_s19 = smov 128   ;;  %s254_s20 = smov 8  }
  0x12   :  { %25 = dma.hbm_to_vmem [thread:$0]  %s320_s0, 256, %s20_s10, [#allocation4], %s253_s19, %s253_s19, %s254_s20  }
  0x13   :  { %s255_s23 = smov [#allocation6]   ;;  %s202_s27 = scalar_lea.hbm %s321_s1, 256 }
  0x14   :  { %s35_s24 = sshll.u32 %s255_s23, 4  ;;  %p203_p8 = scmp.ne.s32.totalorder %s321_s1, %s202_s27  ;;  %s36_s24 = int_to_ptr.vmem [resolvable:$true] %s35_s24 }
  0x15   :  { %p206_p9 = scmp.lt.u32.totalorder %s202_s27, %s321_s1 }
  0x17   :  { %p208_p10 = pnand %p206_p9, %p203_p8 }
  0x19   :  { %211 = shalt.err (!%p208_p10)
}
  0x1a   :  { %s212_s4 = scalar_lea.vmem %s36_s24, 256  ;;  %p217_p12 = scmp.lt.s32.totalorder %s36_s24, %s36_s24 }
  0x1b   :  { %p213_p11 = scmp.ne.s32.totalorder %s36_s24, %s212_s4  ;;  %p218_p13 = scmp.lt.s32.totalorder %s212_s4, %s212_s4 }
  0x1d   :  { %p219_p0 = por %p218_p13, %p217_p12 }
  0x1f   :  { %p220_p1 = pnand %p219_p0, %p213_p11 }
  0x21   :  { %223 = shalt.err (!%p220_p1)
}
  0x22   :  { %41 = dma.hbm_to_vmem [thread:$0]  %s321_s1, 256, %s36_s24, [#allocation7], %s253_s19, %s253_s19, %s254_s20  }
  0x23   :  { %246 = dma.done.wait [#allocation4], 256  }
  0x24   :  { %247 = vsyncadd [#allocation4], 4294967040 }
  0x25   :  { %248 = dma.done.wait [#allocation7], 256  }
  0x26   :  { %249 = vsyncadd [#allocation7], 4294967040  ;;  %v57_v0 = vld [vmem:[#allocation3] sm:$0xff]  ;;  %v58_v1 = vld [vmem:[#allocation3 + $0x8] sm:$0xff]  ;;  %s256_s1 = smov [#allocation8]   ;;  %vm145_vm4 = vcmask 0  }
  0x27   :  { %v61_v2 = vand.u32 2147483647, %v57_v0  ;;  %v62_v3 = vand.u32 2147483647, %v58_v1  ;;  %v59_v21 = vld [vmem:[#allocation6] sm:$0xff]  ;;  %v69_v26 = vmax.f32 %v57_v0, 0.0 }
  0x28   :  { %v71_v27 = vmul.f32 %v59_v21, %v57_v0  ;;  %vm105_vm0 = vcmp.ge.f32.partialorder %v57_v0, 0.0  ;;  %v60_v30 = vld [vmem:[#allocation6 + $0x8] sm:$0xff]  ;;  %v70_v31 = vmax.f32 %v58_v1, 0.0  ;;  %vm106_vm1 = vcmp.ge.f32.partialorder %v58_v1, 0.0  ;;  %s153_s6 = sshll.u32 %s256_s1, 4  ;;  %s154_s6 = int_to_ptr.vmem [resolvable:$true] %s153_s6 }
  0x29   :  { %v63_v4 = vsub.f32 0.0, %v61_v2  ;;  %v64_v5 = vsub.f32 0.0, %v62_v3  ;;  %v72_v34 = vmul.f32 %v60_v30, %v58_v1  ;;  %v121_v37 = vmul.f32 -0.5, %v59_v21  ;;  %s224_s7 = scalar_lea.vmem %s154_s6, 16  ;;  %s228_s8 = scalar_lea.vmem %s154_s6, 32 }
  0x2a   :  { %v122_v49 = vmul.f32 -0.5, %v60_v30  ;;  %v73_v50 = vsub.f32 %v69_v26, %v71_v27  ;;  %p225_p2 = scmp.ne.s32.totalorder %s154_s6, %s224_s7  ;;  %p229_p3 = scmp.lt.s32.totalorder %s154_s6, %s154_s6 }
  0x2b   :  { %v65_v6 = vmul.f32 1.442695, %v63_v4  ;;  %v67_v7 = vmul.f32 1.442695, %v64_v5  ;;  %v74_v52 = vsub.f32 %v70_v31, %v72_v34  ;;  %v123_v57 = vadd.f32 0.75, %v121_v37  ;;  %p230_p4 = scmp.lt.s32.totalorder %s228_s8, %s224_s7 }
  0x2c   :  { %v124_v59 = vadd.f32 0.75, %v122_v49 }
  0x2d   :  { %168 = vpow2.f32 %v65_v6  ;;  %p231_p5 = por %p230_p4, %p229_p3 }
  0x2e   :  { %170 = vpow2.f32 %v67_v7 }
  0x2f   :  { %p232_p6 = pnand %p231_p5, %p225_p2 }
  0x37   :  { %v169_v8 = vpop.eup %168 }
  0x38   :  { %v171_v9 = vpop.eup %170  ;;  %v75_v10 = vadd.f32 1.0, %v169_v8  ;;  %v78_v14 = vmul.f32 -0.5, %v169_v8  ;;  %v81_v19 = vand.u32 2147483647, %v169_v8 }
  0x39   :  { %v84_v11 = vadd.f32 1.0, %v171_v9  ;;  %v87_v15 = vmul.f32 -0.5, %v171_v9  ;;  %v90_v32 = vand.u32 2147483647, %v171_v9 }
  0x3a   :  { %172 = vrcp.f32 %v75_v10  ;;  %v79_v22 = vadd.f32 1.0, %v78_v14  ;;  %vm296_vm2 = vcmp.lt.f32.partialorder %v81_v19, 0.0004427343 }
  0x3b   :  { %174 = vrcp.f32 %v84_v11  ;;  %v88_v23 = vadd.f32 1.0, %v87_v15  ;;  %vm300_vm3 = vcmp.lt.f32.partialorder %v90_v32, 0.0004427343 }
  0x3c   :  { %176 = vlog2.f32 %v75_v10  ;;  %v80_v39 = vmul.f32 %v169_v8, %v79_v22 }
  0x3d   :  { %178 = vlog2.f32 %v84_v11  ;;  %v89_v40 = vmul.f32 %v171_v9, %v88_v23 }
  0x44   :  { %v173_v12 = vpop.eup %172 }
  0x45   :  { %v175_v13 = vpop.eup %174  ;;  %v99_v16 = vmul.f32 %v173_v12, %v75_v10 }
  0x46   :  { %v100_v17 = vmul.f32 %v175_v13, %v84_v11  ;;  %v177_v25 = vpop.eup %176 }
  0x47   :  { %v101_v18 = vsub.f32 2.0, %v99_v16  ;;  %v179_v29 = vpop.eup %178  ;;  %v77_v38 = vmul.f32 0.6931472, %v177_v25 }
  0x48   :  { %v102_v20 = vsub.f32 2.0, %v100_v17  ;;  %v86_v42 = vmul.f32 0.6931472, %v179_v29 }
  0x49   :  { %v103_v24 = vmul.f32 %v173_v12, %v101_v18  ;;  %v83_v53 = vsel %vm296_vm2, %v80_v39, %v77_v38 }
  0x4a   :  { %v104_v28 = vmul.f32 %v175_v13, %v102_v20  ;;  %v92_v55 = vsel %vm300_vm3, %v89_v40, %v86_v42  ;;  %v93_v60 = vadd.f32 %v83_v53, %v73_v50 }
  0x4b   :  { %v107_v33 = vmul.f32 %v169_v8, %v103_v24  ;;  %v94_v62 = vadd.f32 %v92_v55, %v74_v52 }
  0x4c   :  { %v108_v36 = vmul.f32 %v171_v9, %v104_v28 }
  0x4d   :  { %v109_v41 = vsel %vm105_vm0, %v103_v24, %v107_v33 }
  0x4e   :  { %v110_v43 = vsel %vm106_vm1, %v104_v28, %v108_v36  ;;  %v111_v44 = vadd.f32 %v109_v41, %v59_v21  ;;  %v113_v45 = vmul.f32 %v109_v41, %v59_v21 }
  0x4f   :  { %v112_v47 = vadd.f32 %v110_v43, %v60_v30  ;;  %v114_v48 = vmul.f32 %v110_v43, %v60_v30 }
  0x50   :  { %v115_v51 = vmul.f32 2.0, %v113_v45 }
  0x51   :  { %v116_v54 = vmul.f32 2.0, %v114_v48 }
  0x52   :  { %v117_v56 = vsub.f32 %v111_v44, %v115_v51 }
  0x53   :  { %v118_v58 = vsub.f32 %v112_v47, %v116_v54 }
  0x54   :  { %v119_v61 = vmul.f32 %v117_v56, %v117_v56 }
  0x55   :  { %v120_v63 = vmul.f32 %v118_v58, %v118_v58 }
  0x56   :  { %v125_v0 = vmul.f32 %v123_v57, %v119_v61 }
  0x57   :  { %v126_v1 = vmul.f32 %v124_v59, %v120_v63 }
  0x58   :  { %v127_v2 = vmul.f32 %v125_v0, %v93_v60 }
  0x59   :  { %v128_v3 = vmul.f32 %v126_v1, %v94_v62 }
  0x5b   :  { %v130_v4 = vadd.f32 %v128_v3, %v127_v2 }
  0x5d   :  { %v137_v5 = vrot.slane %v130_v4, 4 }
  0x5f   :  { %v138_v6 = vadd.f32 %v137_v5, %v130_v4 }
  0x61   :  { %v139_v7 = vrot.slane %v138_v6, 2 }
  0x63   :  { %v140_v8 = vadd.f32 %v139_v7, %v138_v6 }
  0x65   :  { %v141_v9 = vrot.slane %v140_v8, 1 }
  0x67   :  { %v142_v10 = vadd.f32 %v141_v9, %v140_v8 }
  0x69   :  { %143 = vadd.xlane.f32.xlu0 %v142_v10 }
  0xf6   :  { %v144_v11 = vpop.xlane.xlu0 %143 }
  0xf7   :  { %146 = vst.msk [vmem:[#allocation8] sm:$0x1] %vm145_vm4, %v144_v11 }
  0xf8   :  { %235 = shalt.err (!%p232_p6)
}
  0xf9   :  { %s236_s11 = scalar_lea.hbm %s322_s2, 16 }
  0xfa   :  { %p237_p7 = scmp.ne.s32.totalorder %s322_s2, %s236_s11  ;;  %p240_p8 = scmp.lt.u32.totalorder %s236_s11, %s322_s2 }
  0xfc   :  { %p242_p9 = pnand %p240_p8, %p237_p7 }
  0xfe   :  { %245 = shalt.err (!%p242_p9)
}
  0xff   :  { %156 = dma.vmem_to_hbm [thread:$0]  %s154_s6, 16, %s322_s2, [#allocation5]  }
 0x100   :  { %250 = dma.done.wait [#allocation5], 16  }
 0x101   :  { %251 = vsyncadd [#allocation5], 4294967280 }
 0x102   :  { %160 = vsyncpa [#allocation4], 1 }
 0x103   :  { %161 = vsyncpa [#allocation7], 1 }
 0x104   :  { %162 = vsyncpa [#allocation5], 1 }

</bundles_post_ra>
